<compile_context>
chip_gen: v6e
topology: v6e:2x2x1
jax: 0.10.0
libtpu: 0.0.40
codegen_flags: <defaults>
</compile_context>

<pallas_src>
import functools

import jax
import jax.numpy as jnp
from jax.experimental import pallas as pl
from jax.experimental.pallas import tpu as pltpu


def _sb_distill_kernel(labels_ref, *rest, temperature, alpha, lamb, n_heads,
                       batch_size, total_rows, mask_tail):
    head_refs = rest[:n_heads]
    out_ref = rest[n_heads]

    b = pl.program_id(0)
    tb, n_cls = head_refs[0].shape

    inv_T = 1.0 / temperature
    inv_B = 1.0 / batch_size
    compute_soft = lamb > 0.0

    labels = labels_ref[...]                                  # (TB, 1) int32
    # Boolean one-hot mask: never materialized as f32.
    label_mask = (jax.lax.broadcasted_iota(jnp.int32, (tb, n_cls), 1) == labels)

    if mask_tail:
        # Rows past the true batch size (padded tail tile) must not contribute.
        row_ids = b * tb + jax.lax.broadcasted_iota(jnp.int32, (tb, 1), 0)
        row_valid = row_ids < total_rows

        def _mask_rows(v):                                    # v: (TB, 1) f32
            return jnp.where(row_valid, v, 0.0)
    else:
        def _mask_rows(v):
            return v

    def hard_stats(x):
        """Stable logits z = x - rowmax and per-row CE(x, label) = lse - z[label]."""
        m = jnp.max(x, axis=-1, keepdims=True)
        z = x - m
        lse = jnp.log(jnp.sum(jnp.exp(z), axis=-1, keepdims=True))
        picked = jnp.sum(jnp.where(label_mask, z, 0.0), axis=-1, keepdims=True)
        return z, lse - picked

    # ---- teacher head (head 0): stats computed once per tile ----
    x0 = head_refs[0][...].astype(jnp.float32)
    z0, ce0_rows = hard_stats(x0)
    hard_sum = jnp.sum(_mask_rows(ce0_rows))

    if compute_soft:
        # Shared row max: max(x/T) = max(x)/T, so z0*inv_T is already stable.
        es0 = jnp.exp(z0 * inv_T)                             # persistent (TB,C)
        inv_s0 = pl.reciprocal(jnp.sum(es0, axis=-1, keepdims=True))  # (TB,1)

    soft_sum = jnp.float32(0.0)
    for i in range(1, n_heads):
        xi = head_refs[i][...].astype(jnp.float32)
        zi, cei_rows = hard_stats(xi)
        hard_sum = hard_sum + alpha * jnp.sum(_mask_rows(cei_rows))

        if compute_soft:
            esi = jnp.exp(zi * inv_T)
            inv_si = pl.reciprocal(jnp.sum(esi, axis=-1, keepdims=True))
            # Symmetric KL per row via log-cancellation (row-constant terms drop
            # because sum_c p = sum_c q = 1):
            #   sum_c (p_i - q0)(log p_i - log q0)
            # = (1/T) * [ rowsum(e_i*d)/s_i - rowsum(e_0*d)/s_0 ],  d = x_i - x_0
            # Teacher logits re-read from their resident VMEM block (cheap vld),
            # keeping only es0/inv_s0 live across the unrolled head loop.
            d = xi - head_refs[0][...].astype(jnp.float32)
            r_i = jnp.sum(esi * d, axis=-1, keepdims=True) * inv_si
            r_0 = jnp.sum(es0 * d, axis=-1, keepdims=True) * inv_s0
            soft_sum = soft_sum + jnp.sum(_mask_rows(r_i - r_0))

    hard = hard_sum * inv_B / ((n_heads - 1) * alpha + 1.0)
    total = (1.0 - lamb) * hard
    if compute_soft:
        soft = soft_sum * inv_T * inv_B / (2.0 * (n_heads - 1) + 1e-8)
        total = total + lamb * soft

    # Each grid step owns its (1, 8, 128) output slab -> no revisited block, so
    # the batch axis can be "parallel" (megacore on v7x). Wrapper reduces [:,0,0].
    out_ref[...] = jnp.full(out_ref.shape, total, dtype=jnp.float32)


def _vmem_capacity_bytes():
    try:
        return int(pltpu.get_tpu_info().vmem_capacity_bytes)
    except Exception:
        return 64 << 20          # conservative (v7x-sized) fallback


def _pick_batch_tile(B, C, n_heads, in_itemsize, tile_budget):
    """Largest batch tile whose full working set fits in the VMEM budget:
    double-buffered per-head input tiles + ~6 live f32 (TB,C) temporaries
    inside the kernel + the (lane-padded) labels block."""
    per_row = 2 * n_heads * C * in_itemsize + 6 * C * 4 + 2 * 128 * 4
    max_tb = min(1024, tile_budget // per_row)
    max_tb -= max_tb % 8
    max_tb = max(8, max_tb)
    if B <= max_tb:
        return B                                  # single tile; block == full dims
    for cand in range(max_tb, 7, -8):             # prefer an exact divisor of B
        if B % cand == 0:
            return cand
    return max_tb                                 # masked tail tile


def sb_distillation_loss(inputs, target, *, temperature=3.0, alpha=1.0,
                         lamb=0.333, block_rows=None):
    """inputs: list of (B, C) logits arrays; target: (B,) int labels."""
    n_heads = len(inputs)
    B, C = inputs[0].shape
    labels = target.astype(jnp.int32).reshape(B, 1)

    in_itemsize = max(jnp.dtype(x.dtype).itemsize for x in inputs)

    # Generation-aware budgets: v5e/v6e have 128 MiB VMEM, v7x only 64 MiB.
    if _vmem_capacity_bytes() >= (100 << 20):
        vmem_limit = 64 << 20
        tile_budget = 40 << 20
    else:
        vmem_limit = 32 << 20
        tile_budget = 20 << 20

    tb = block_rows if block_rows is not None else _pick_batch_tile(
        B, C, n_heads, in_itemsize, tile_budget)
    num_tiles = pl.cdiv(B, tb)
    mask_tail = (B % tb) != 0

    kernel = functools.partial(
        _sb_distill_kernel,
        temperature=float(temperature), alpha=float(alpha), lamb=float(lamb),
        n_heads=n_heads, batch_size=float(B), total_rows=B, mask_tail=mask_tail)

    in_specs = [pl.BlockSpec((tb, 1), lambda b: (b, 0))]
    in_specs += [pl.BlockSpec((tb, C), lambda b: (b, 0)) for _ in range(n_heads)]

    partials = pl.pallas_call(
        kernel,
        out_shape=jax.ShapeDtypeStruct((num_tiles, 8, 128), jnp.float32),
        grid=(num_tiles,),
        in_specs=in_specs,
        out_specs=pl.BlockSpec((1, 8, 128), lambda b: (b, 0, 0)),
        compiler_params=pltpu.CompilerParams(
            dimension_semantics=("parallel",),
            vmem_limit_bytes=vmem_limit),
    )(labels, *inputs)
    return jnp.sum(partials[:, 0, 0])


def _reference_loss(inputs, target, temperature=3.0, alpha=1.0, lamb=0.333):
    # Pure-JAX reference mirroring the PyTorch forward.
    def ce(logits, labels):
        lp = jax.nn.log_softmax(logits, axis=1)
        return -jnp.mean(jnp.take_along_axis(lp, labels[:, None], axis=1))

    def soft_kl(inp, tgt):
        lp = jax.nn.log_softmax(inp / temperature, axis=1)
        q = jax.nn.softmax(tgt / temperature, axis=1)
        return jnp.sum(q * (jnp.log(q) - lp)) / inp.shape[0]

    finput = inputs[0]
    hard = ce(finput, target)
    for i in range(1, len(inputs)):
        hard = hard + ce(inputs[i], target) * alpha
    hard = hard / ((len(inputs) - 1) * alpha + 1)
    soft = 0.0
    if lamb > 0:
        for i in range(1, len(inputs)):
            soft = soft + soft_kl(inputs[i], finput)
            soft = soft + soft_kl(finput, inputs[i])
        soft = soft / (2 * (len(inputs) - 1) + 1e-8)
    return lamb * soft + (1 - lamb) * hard


if __name__ == "__main__":
    key = jax.random.PRNGKey(0)

    # Test 1: small shapes, single batch tile.
    B, C, N_HEADS = 8, 32, 3
    keys = jax.random.split(key, N_HEADS + 1)
    inputs = [jax.random.normal(keys[i], (B, C), dtype=jnp.float32)
              for i in range(N_HEADS)]
    target = jax.random.randint(keys[-1], (B,), 0, C, dtype=jnp.int32)

    loss = sb_distillation_loss(inputs, target, temperature=3.0, alpha=1.0,
                                lamb=0.333)
    loss = jax.block_until_ready(loss)
    ref = _reference_loss(inputs, target, 3.0, 1.0, 0.333)
    assert jnp.allclose(loss, ref, rtol=1e-4, atol=1e-5), (loss, ref)

    # Test 2: larger batch exercising the multi-tile partial-sum path.
    B2, C2, N2 = 32, 32, 4
    keys2 = jax.random.split(jax.random.PRNGKey(1), N2 + 1)
    inputs2 = [jax.random.normal(keys2[i], (B2, C2), dtype=jnp.float32)
               for i in range(N2)]
    target2 = jax.random.randint(keys2[-1], (B2,), 0, C2, dtype=jnp.int32)

    loss2 = sb_distillation_loss(inputs2, target2, temperature=2.0, alpha=0.5,
                                 lamb=0.25, block_rows=8)
    loss2 = jax.block_until_ready(loss2)
    ref2 = _reference_loss(inputs2, target2, 2.0, 0.5, 0.25)
    assert jnp.allclose(loss2, ref2, rtol=1e-4, atol=1e-5), (loss2, ref2)

    # Test 3: batch not divisible by the tile -> masked tail tile.
    B3, C3, N3 = 20, 32, 3
    keys3 = jax.random.split(jax.random.PRNGKey(2), N3 + 1)
    inputs3 = [jax.random.normal(keys3[i], (B3, C3), dtype=jnp.float32)
               for i in range(N3)]
    target3 = jax.random.randint(keys3[-1], (B3,), 0, C3, dtype=jnp.int32)

    loss3 = sb_distillation_loss(inputs3, target3, temperature=3.0, alpha=1.0,
                                 lamb=0.333, block_rows=8)
    loss3 = jax.block_until_ready(loss3)
    ref3 = _reference_loss(inputs3, target3, 3.0, 1.0, 0.333)
    assert jnp.allclose(loss3, ref3, rtol=1e-4, atol=1e-5), (loss3, ref3)

    print("KERNEL_OK")
</pallas_src>

<mosaic_0001>
module attributes {stable_mosaic.version = 11 : i64} {
  func.func @_sb_distill_kernel(%arg0: i32, %arg1: memref<8x1xi32, #tpu.memory_space<vmem>>, %arg2: memref<8x32xf32, #tpu.memory_space<vmem>>, %arg3: memref<8x32xf32, #tpu.memory_space<vmem>>, %arg4: memref<8x32xf32, #tpu.memory_space<vmem>>, %arg5: memref<1x8x128xf32, #tpu.memory_space<vmem>>) attributes {dimension_semantics = [#tpu.dimension_semantics<parallel>], iteration_bounds = array<i64: 1>, scalar_prefetch = 0 : i64, scratch_operands = 0 : i64, tpu.core_type = #tpu.core_type<tc>, window_params = [{transform_indices = @transform_0, window_bounds = array<i64: 8, 1>}, {transform_indices = @transform_1, window_bounds = array<i64: 8, 32>}, {transform_indices = @transform_2, window_bounds = array<i64: 8, 32>}, {transform_indices = @transform_3, window_bounds = array<i64: 8, 32>}, {transform_indices = @transform_4, window_bounds = array<i64: 1, 8, 128>}]} {
    %c0 = arith.constant 0 : index
    %c0_0 = arith.constant 0 : index
    %0 = vector.load %arg1[%c0, %c0_0] : memref<8x1xi32, #tpu.memory_space<vmem>>, vector<8x1xi32>
    %1 = tpu.iota {dimensions = array<i32: 1>} : vector<8x32xi32>
    %2 = vector.broadcast %0 : vector<8x1xi32> to vector<8x32xi32>
    %3 = arith.cmpi eq, %1, %2 : vector<8x32xi32>
    %c0_1 = arith.constant 0 : index
    %c0_2 = arith.constant 0 : index
    %4 = vector.load %arg2[%c0_1, %c0_2] : memref<8x32xf32, #tpu.memory_space<vmem>>, vector<8x32xf32>
    %cst = arith.constant dense<0xFF800000> : vector<8xf32>
    %5 = vector.multi_reduction <maximumf>, %4, %cst [1] : vector<8x32xf32> to vector<8xf32>
    %6 = vector.shape_cast %5 : vector<8xf32> to vector<8x1xf32>
    %7 = vector.broadcast %6 : vector<8x1xf32> to vector<8x32xf32>
    %8 = arith.subf %4, %7 : vector<8x32xf32>
    %9 = math.exp %8 : vector<8x32xf32>
    %cst_3 = arith.constant dense<0.000000e+00> : vector<8xf32>
    %10 = vector.multi_reduction <add>, %9, %cst_3 [1] : vector<8x32xf32> to vector<8xf32>
    %11 = vector.shape_cast %10 : vector<8xf32> to vector<8x1xf32>
    %12 = math.log %11 : vector<8x1xf32>
    %cst_4 = arith.constant 0.000000e+00 : f32
    %13 = vector.broadcast %cst_4 : f32 to vector<8x32xf32>
    %14 = arith.select %3, %8, %13 : vector<8x32xi1>, vector<8x32xf32>
    %cst_5 = arith.constant dense<0.000000e+00> : vector<8xf32>
    %15 = vector.multi_reduction <add>, %14, %cst_5 [1] : vector<8x32xf32> to vector<8xf32>
    %16 = vector.shape_cast %15 : vector<8xf32> to vector<8x1xf32>
    %17 = arith.subf %12, %16 : vector<8x1xf32>
    %18 = vector.shape_cast %17 : vector<8x1xf32> to vector<1x8x1xf32>
    %cst_6 = arith.constant dense<0.000000e+00> : vector<1xf32>
    %19 = vector.multi_reduction <add>, %18, %cst_6 [1, 2] : vector<1x8x1xf32> to vector<1xf32>
    %20 = vector.shape_cast %19 : vector<1xf32> to vector<1x1x1xf32>
    %21 = vector.extract %20[0, 0, 0] : f32 from vector<1x1x1xf32>
    %cst_7 = arith.constant 0.333333343 : f32
    %22 = vector.broadcast %cst_7 : f32 to vector<8x32xf32>
    %23 = arith.mulf %8, %22 : vector<8x32xf32>
    %24 = math.exp %23 : vector<8x32xf32>
    %cst_8 = arith.constant dense<0.000000e+00> : vector<8xf32>
    %25 = vector.multi_reduction <add>, %24, %cst_8 [1] : vector<8x32xf32> to vector<8xf32>
    %26 = vector.shape_cast %25 : vector<8xf32> to vector<8x1xf32>
    %27 = tpu.reciprocal %26 : vector<8x1xf32> -> vector<8x1xf32>
    %c0_9 = arith.constant 0 : index
    %c0_10 = arith.constant 0 : index
    %28 = vector.load %arg3[%c0_9, %c0_10] : memref<8x32xf32, #tpu.memory_space<vmem>>, vector<8x32xf32>
    %cst_11 = arith.constant dense<0xFF800000> : vector<8xf32>
    %29 = vector.multi_reduction <maximumf>, %28, %cst_11 [1] : vector<8x32xf32> to vector<8xf32>
    %30 = vector.shape_cast %29 : vector<8xf32> to vector<8x1xf32>
    %31 = vector.broadcast %30 : vector<8x1xf32> to vector<8x32xf32>
    %32 = arith.subf %28, %31 : vector<8x32xf32>
    %33 = math.exp %32 : vector<8x32xf32>
    %cst_12 = arith.constant dense<0.000000e+00> : vector<8xf32>
    %34 = vector.multi_reduction <add>, %33, %cst_12 [1] : vector<8x32xf32> to vector<8xf32>
    %35 = vector.shape_cast %34 : vector<8xf32> to vector<8x1xf32>
    %36 = math.log %35 : vector<8x1xf32>
    %cst_13 = arith.constant 0.000000e+00 : f32
    %37 = vector.broadcast %cst_13 : f32 to vector<8x32xf32>
    %38 = arith.select %3, %32, %37 : vector<8x32xi1>, vector<8x32xf32>
    %cst_14 = arith.constant dense<0.000000e+00> : vector<8xf32>
    %39 = vector.multi_reduction <add>, %38, %cst_14 [1] : vector<8x32xf32> to vector<8xf32>
    %40 = vector.shape_cast %39 : vector<8xf32> to vector<8x1xf32>
    %41 = arith.subf %36, %40 : vector<8x1xf32>
    %42 = vector.shape_cast %41 : vector<8x1xf32> to vector<1x8x1xf32>
    %cst_15 = arith.constant dense<0.000000e+00> : vector<1xf32>
    %43 = vector.multi_reduction <add>, %42, %cst_15 [1, 2] : vector<1x8x1xf32> to vector<1xf32>
    %44 = vector.shape_cast %43 : vector<1xf32> to vector<1x1x1xf32>
    %45 = vector.extract %44[0, 0, 0] : f32 from vector<1x1x1xf32>
    %cst_16 = arith.constant 1.000000e+00 : f32
    %46 = arith.mulf %cst_16, %45 : f32
    %47 = arith.addf %21, %46 : f32
    %cst_17 = arith.constant 0.333333343 : f32
    %48 = vector.broadcast %cst_17 : f32 to vector<8x32xf32>
    %49 = arith.mulf %32, %48 : vector<8x32xf32>
    %50 = math.exp %49 : vector<8x32xf32>
    %cst_18 = arith.constant dense<0.000000e+00> : vector<8xf32>
    %51 = vector.multi_reduction <add>, %50, %cst_18 [1] : vector<8x32xf32> to vector<8xf32>
    %52 = vector.shape_cast %51 : vector<8xf32> to vector<8x1xf32>
    %53 = tpu.reciprocal %52 : vector<8x1xf32> -> vector<8x1xf32>
    %c0_19 = arith.constant 0 : index
    %c0_20 = arith.constant 0 : index
    %54 = vector.load %arg2[%c0_19, %c0_20] : memref<8x32xf32, #tpu.memory_space<vmem>>, vector<8x32xf32>
    %55 = arith.subf %28, %54 : vector<8x32xf32>
    %56 = arith.mulf %50, %55 : vector<8x32xf32>
    %cst_21 = arith.constant dense<0.000000e+00> : vector<8xf32>
    %57 = vector.multi_reduction <add>, %56, %cst_21 [1] : vector<8x32xf32> to vector<8xf32>
    %58 = vector.shape_cast %57 : vector<8xf32> to vector<8x1xf32>
    %59 = arith.mulf %58, %53 : vector<8x1xf32>
    %60 = arith.mulf %24, %55 : vector<8x32xf32>
    %cst_22 = arith.constant dense<0.000000e+00> : vector<8xf32>
    %61 = vector.multi_reduction <add>, %60, %cst_22 [1] : vector<8x32xf32> to vector<8xf32>
    %62 = vector.shape_cast %61 : vector<8xf32> to vector<8x1xf32>
    %63 = arith.mulf %62, %27 : vector<8x1xf32>
    %64 = arith.subf %59, %63 : vector<8x1xf32>
    %65 = vector.shape_cast %64 : vector<8x1xf32> to vector<1x8x1xf32>
    %cst_23 = arith.constant dense<0.000000e+00> : vector<1xf32>
    %66 = vector.multi_reduction <add>, %65, %cst_23 [1, 2] : vector<1x8x1xf32> to vector<1xf32>
    %67 = vector.shape_cast %66 : vector<1xf32> to vector<1x1x1xf32>
    %68 = vector.extract %67[0, 0, 0] : f32 from vector<1x1x1xf32>
    %cst_24 = arith.constant 0.000000e+00 : f32
    %69 = arith.addf %cst_24, %68 : f32
    %c0_25 = arith.constant 0 : index
    %c0_26 = arith.constant 0 : index
    %70 = vector.load %arg4[%c0_25, %c0_26] : memref<8x32xf32, #tpu.memory_space<vmem>>, vector<8x32xf32>
    %cst_27 = arith.constant dense<0xFF800000> : vector<8xf32>
    %71 = vector.multi_reduction <maximumf>, %70, %cst_27 [1] : vector<8x32xf32> to vector<8xf32>
    %72 = vector.shape_cast %71 : vector<8xf32> to vector<8x1xf32>
    %73 = vector.broadcast %72 : vector<8x1xf32> to vector<8x32xf32>
    %74 = arith.subf %70, %73 : vector<8x32xf32>
    %75 = math.exp %74 : vector<8x32xf32>
    %cst_28 = arith.constant dense<0.000000e+00> : vector<8xf32>
    %76 = vector.multi_reduction <add>, %75, %cst_28 [1] : vector<8x32xf32> to vector<8xf32>
    %77 = vector.shape_cast %76 : vector<8xf32> to vector<8x1xf32>
    %78 = math.log %77 : vector<8x1xf32>
    %cst_29 = arith.constant 0.000000e+00 : f32
    %79 = vector.broadcast %cst_29 : f32 to vector<8x32xf32>
    %80 = arith.select %3, %74, %79 : vector<8x32xi1>, vector<8x32xf32>
    %cst_30 = arith.constant dense<0.000000e+00> : vector<8xf32>
    %81 = vector.multi_reduction <add>, %80, %cst_30 [1] : vector<8x32xf32> to vector<8xf32>
    %82 = vector.shape_cast %81 : vector<8xf32> to vector<8x1xf32>
    %83 = arith.subf %78, %82 : vector<8x1xf32>
    %84 = vector.shape_cast %83 : vector<8x1xf32> to vector<1x8x1xf32>
    %cst_31 = arith.constant dense<0.000000e+00> : vector<1xf32>
    %85 = vector.multi_reduction <add>, %84, %cst_31 [1, 2] : vector<1x8x1xf32> to vector<1xf32>
    %86 = vector.shape_cast %85 : vector<1xf32> to vector<1x1x1xf32>
    %87 = vector.extract %86[0, 0, 0] : f32 from vector<1x1x1xf32>
    %cst_32 = arith.constant 1.000000e+00 : f32
    %88 = arith.mulf %cst_32, %87 : f32
    %89 = arith.addf %47, %88 : f32
    %cst_33 = arith.constant 0.333333343 : f32
    %90 = vector.broadcast %cst_33 : f32 to vector<8x32xf32>
    %91 = arith.mulf %74, %90 : vector<8x32xf32>
    %92 = math.exp %91 : vector<8x32xf32>
    %cst_34 = arith.constant dense<0.000000e+00> : vector<8xf32>
    %93 = vector.multi_reduction <add>, %92, %cst_34 [1] : vector<8x32xf32> to vector<8xf32>
    %94 = vector.shape_cast %93 : vector<8xf32> to vector<8x1xf32>
    %95 = tpu.reciprocal %94 : vector<8x1xf32> -> vector<8x1xf32>
    %c0_35 = arith.constant 0 : index
    %c0_36 = arith.constant 0 : index
    %96 = vector.load %arg2[%c0_35, %c0_36] : memref<8x32xf32, #tpu.memory_space<vmem>>, vector<8x32xf32>
    %97 = arith.subf %70, %96 : vector<8x32xf32>
    %98 = arith.mulf %92, %97 : vector<8x32xf32>
    %cst_37 = arith.constant dense<0.000000e+00> : vector<8xf32>
    %99 = vector.multi_reduction <add>, %98, %cst_37 [1] : vector<8x32xf32> to vector<8xf32>
    %100 = vector.shape_cast %99 : vector<8xf32> to vector<8x1xf32>
    %101 = arith.mulf %100, %95 : vector<8x1xf32>
    %102 = arith.mulf %24, %97 : vector<8x32xf32>
    %cst_38 = arith.constant dense<0.000000e+00> : vector<8xf32>
    %103 = vector.multi_reduction <add>, %102, %cst_38 [1] : vector<8x32xf32> to vector<8xf32>
    %104 = vector.shape_cast %103 : vector<8xf32> to vector<8x1xf32>
    %105 = arith.mulf %104, %27 : vector<8x1xf32>
    %106 = arith.subf %101, %105 : vector<8x1xf32>
    %107 = vector.shape_cast %106 : vector<8x1xf32> to vector<1x8x1xf32>
    %cst_39 = arith.constant dense<0.000000e+00> : vector<1xf32>
    %108 = vector.multi_reduction <add>, %107, %cst_39 [1, 2] : vector<1x8x1xf32> to vector<1xf32>
    %109 = vector.shape_cast %108 : vector<1xf32> to vector<1x1x1xf32>
    %110 = vector.extract %109[0, 0, 0] : f32 from vector<1x1x1xf32>
    %111 = arith.addf %69, %110 : f32
    %cst_40 = arith.constant 1.250000e-01 : f32
    %112 = arith.mulf %89, %cst_40 : f32
    %cst_41 = arith.constant 3.000000e+00 : f32
    %113 = arith.divf %112, %cst_41 : f32
    %cst_42 = arith.constant 0.666999995 : f32
    %114 = arith.mulf %cst_42, %113 : f32
    %cst_43 = arith.constant 0.333333343 : f32
    %115 = arith.mulf %111, %cst_43 : f32
    %cst_44 = arith.constant 1.250000e-01 : f32
    %116 = arith.mulf %115, %cst_44 : f32
    %cst_45 = arith.constant 4.000000e+00 : f32
    %117 = arith.divf %116, %cst_45 : f32
    %cst_46 = arith.constant 3.330000e-01 : f32
    %118 = arith.mulf %cst_46, %117 : f32
    %119 = arith.addf %114, %118 : f32
    %120 = vector.broadcast %119 : f32 to vector<1x8x128xf32>
    %c0_47 = arith.constant 0 : index
    %c0_48 = arith.constant 0 : index
    %c0_49 = arith.constant 0 : index
    %121 = vector.load %arg5[%c0_47, %c0_48, %c0_49] : memref<1x8x128xf32, #tpu.memory_space<vmem>>, vector<1x8x128xf32>
    tpu.vector_store %arg5[%c0_47, %c0_48, %c0_49], %120 {strides = array<i32>} : memref<1x8x128xf32, #tpu.memory_space<vmem>>, vector<1x8x128xf32>,
    return
  }
  func.func @transform_0(%arg0: i32) -> (i32, i32) {
    %c0_i32 = arith.constant 0 : i32
    %c0_i32_0 = arith.constant 0 : i32
    return %arg0, %c0_i32 : i32, i32
  }
  func.func @transform_1(%arg0: i32) -> (i32, i32) {
    %c0_i32 = arith.constant 0 : i32
    %c0_i32_0 = arith.constant 0 : i32
    return %arg0, %c0_i32 : i32, i32
  }
  func.func @transform_2(%arg0: i32) -> (i32, i32) {
    %c0_i32 = arith.constant 0 : i32
    %c0_i32_0 = arith.constant 0 : i32
    return %arg0, %c0_i32 : i32, i32
  }
  func.func @transform_3(%arg0: i32) -> (i32, i32) {
    %c0_i32 = arith.constant 0 : i32
    %c0_i32_0 = arith.constant 0 : i32
    return %arg0, %c0_i32 : i32, i32
  }
  func.func @transform_4(%arg0: i32) -> (i32, i32, i32) {
    %c0_i32 = arith.constant 0 : i32
    %c0_i32_0 = arith.constant 0 : i32
    %c0_i32_1 = arith.constant 0 : i32
    return %arg0, %c0_i32, %c0_i32_0 : i32, i32, i32
  }
}

</mosaic_0001>

<bundles_post_ra>
// kernel: tpu_custom_call.1
= control target key start
LH: loop header
LB: loop body
LE: loop exit
PB: predicated region body
PF: predicated region fallthrough
CT: control target
= control target key end

     0   :  { %9 = vsyncpa [#allocation3], 0  ;;  %s416_s0 = inlined_call_operand.vmem [shape: s32[8,1], index: 0, kind: input, shape index: {}]   ;;  %s417_s1 = inlined_call_operand.vmem [shape: f32[8,32], index: 1, kind: input, shape index: {}]   ;;  %s418_s2 = inlined_call_operand.hbm [shape: f32[8,32], index: 2, kind: input, shape index: {}]   ;;  %s419_s3 = inlined_call_operand.hbm [shape: f32[8,32], index: 3, kind: input, shape index: {}]   ;;  %s420_s4 = inlined_call_operand.hbm [shape: f32[1,8,128], index: 4, kind: output, shape index: {}]  }
   0x1   :  { %10 = vsyncpa [#allocation6], 0 }
   0x2   :  { %11 = vsyncpa [#allocation4], 0  ;;  %s337_s15 = smov [#allocation2]   ;;  %s338_s17 = smov [#allocation5]  }
   0x3   :  { %s22_s16 = sshll.u32 %s337_s15, 4  ;;  %s32_s18 = sshll.u32 %s338_s17, 4  ;;  %s23_s16 = int_to_ptr.vmem [resolvable:$true] %s22_s16  ;;  %s33_s18 = int_to_ptr.vmem [resolvable:$true] %s32_s18 }
   0x4   :  { %s279_s19 = scalar_lea.vmem %s23_s16, 128  ;;  %p284_p1 = scmp.lt.s32.totalorder %s23_s16, %s23_s16 }
   0x5   :  { %p280_p0 = scmp.ne.s32.totalorder %s23_s16, %s279_s19  ;;  %p285_p2 = scmp.lt.s32.totalorder %s279_s19, %s279_s19 }
   0x7   :  { %p286_p3 = por %p285_p2, %p284_p1 }
   0x9   :  { %p287_p4 = pnand %p286_p3, %p280_p0 }
   0xb   :  { %290 = shalt.err (!%p287_p4)
}
   0xc   :  { %25 = dma.hbm_to_vmem [thread:$0]  %s418_s2, 128, %s23_s16, [#allocation3]  }
   0xd   :  { %s299_s22 = scalar_lea.vmem %s33_s18, 128  ;;  %p304_p6 = scmp.lt.s32.totalorder %s33_s18, %s33_s18 }
   0xe   :  { %p300_p5 = scmp.ne.s32.totalorder %s33_s18, %s299_s22  ;;  %p305_p7 = scmp.lt.s32.totalorder %s299_s22, %s299_s22 }
  0x10   :  { %p306_p8 = por %p305_p7, %p304_p6 }
  0x12   :  { %p307_p9 = pnand %p306_p8, %p300_p5 }
  0x14   :  { %310 = shalt.err (!%p307_p9)
}
  0x15   :  { %35 = dma.hbm_to_vmem [thread:$0]  %s419_s3, 128, %s33_s18, [#allocation6]  }
  0x16   :  { %331 = dma.done.wait [#allocation3], 128  }
  0x17   :  { %332 = vsyncadd [#allocation3], 4294967168 }
  0x18   :  { %333 = dma.done.wait [#allocation6], 128  }
  0x19   :  { %334 = vsyncadd [#allocation6], 4294967168  ;;  %v339_v0 = vmov 0   ;;  %vm50_vm0 = vcmask 261120   ;;  %v372_v1 = vld [vmem:[#allocation5] sm:$0xff]  ;;  %v377_v2 = vld [vmem:[%s417_s1] sm:$0xff]  ;;  %v43_v18 = vlaneseq }
  0x1a   :  { %245 = vset.pattern.permute.xlu1 %v339_v0  ;;  %246 = vset.pattern.permute.xlu0 %v339_v0  ;;  %v85_v3 = vld [vmem:[#allocation2] sm:$0xff]  ;;  %v144_v4 = vsel %vm50_vm0, %v372_v1, -inf  ;;  %v51_v5 = vsel %vm50_vm0, %v377_v2, -inf  ;;  %v178_v46 = vsub.f32 %v372_v1, %v377_v2  ;;  %vm67_vm2 = vcmask 7168   ;;  %s340_s14 = smov [#allocation7]  }
  0x1b   :  { %145 = vmax.xlane.f32.xlu1 %v144_v4  ;;  %52 = vmax.xlane.f32.xlu0 %v51_v5  ;;  %v86_v6 = vsel %vm50_vm0, %v85_v3, -inf  ;;  %v42_v7 = vld [vmem:[%s416_s0] sm:$0xff]  ;;  %v44_v22 = vand.u32 127, %v43_v18  ;;  %v120_v41 = vsub.f32 %v85_v3, %v377_v2  ;;  %s221_s15 = sshll.u32 %s340_s14, 4  ;;  %s222_s15 = int_to_ptr.vmem [resolvable:$true] %s221_s15 }
  0x1c   :  { %s311_s17 = scalar_lea.vmem %s222_s15, 128  ;;  %p316_p11 = scmp.lt.s32.totalorder %s222_s15, %s222_s15 }
  0x1d   :  { %p312_p10 = scmp.ne.s32.totalorder %s222_s15, %s311_s17  ;;  %p317_p12 = scmp.lt.s32.totalorder %s311_s17, %s311_s17 }
  0x1f   :  { %87 = vmax.xlane.f32.xlu0 %v86_v6  ;;  %p318_p13 = por %p317_p12, %p316_p11 }
  0x21   :  { %p319_p0 = pnand %p318_p13, %p312_p10 }
  0x2c   :  { %46 = vperm.xlu1 %245, %v42_v7  }
  0xa4   :  { %v146_v8 = vpop.xlane.xlu1 %145  ;;  %v53_v9 = vpop.xlane.xlu0 %52 }
  0xa5   :  { %v147_v10 = vsub.f32 %v372_v1, %v146_v8  ;;  %v54_v11 = vsub.f32 %v377_v2, %v53_v9 }
  0xa7   :  { %v148_v12 = vmul.f32 1.442695, %v147_v10  ;;  %v55_v13 = vmul.f32 1.442695, %v54_v11  ;;  %v78_v17 = vmul.f32 0.33333334, %v54_v11 }
  0xa8   :  { %v88_v14 = vpop.xlane.xlu0 %87  ;;  %v47_v24 = vpop.permute.xlu1 %46  ;;  %v171_v26 = vmul.f32 0.33333334, %v147_v10 }
  0xa9   :  { %247 = vpow2.f32 %v148_v12  ;;  %v89_v15 = vsub.f32 %v85_v3, %v88_v14  ;;  %v79_v19 = vmul.f32 1.442695, %v78_v17  ;;  %vm48_vm1 = vcmp.eq.s32.totalorder %v44_v22, %v47_v24 }
  0xaa   :  { %249 = vpow2.f32 %v55_v13  ;;  %v172_v31 = vmul.f32 1.442695, %v171_v26  ;;  %v62_v32 = vsel %vm48_vm1, %v54_v11, 0.0  ;;  %v155_v52 = vsel %vm48_vm1, %v147_v10, 0.0 }
  0xab   :  { %v90_v16 = vmul.f32 1.442695, %v89_v15  ;;  %v113_v20 = vmul.f32 0.33333334, %v89_v15  ;;  %v63_v33 = vsel %vm50_vm0, %v62_v32, 0.0  ;;  %v97_v34 = vsel %vm48_vm1, %v89_v15, 0.0 }
  0xac   :  { %v98_v35 = vsel %vm50_vm0, %v97_v34, 0.0  ;;  %v156_v53 = vsel %vm50_vm0, %v155_v52, 0.0 }
  0xad   :  { %251 = vpow2.f32 %v90_v16  ;;  %v114_v27 = vmul.f32 1.442695, %v113_v20 }
  0xae   :  { %253 = vpow2.f32 %v79_v19 }
  0xaf   :  { %255 = vpow2.f32 %v114_v27 }
  0xb0   :  { %257 = vpow2.f32 %v172_v31 }
  0xb6   :  { %v248_v21 = vpop.eup %247 }
  0xb7   :  { %v250_v23 = vpop.eup %249  ;;  %v150_v25 = vsel %vm50_vm0, %v248_v21, 0.0 }
  0xb8   :  { %v57_v28 = vsel %vm50_vm0, %v250_v23, 0.0  ;;  %151 = vadd.xlane.f32.xlu1 %v150_v25 }
  0xb9   :  { %58 = vadd.xlane.f32.xlu0 %v57_v28 }
  0xba   :  { %v252_v29 = vpop.eup %251 }
  0xbb   :  { %v92_v30 = vsel %vm50_vm0, %v252_v29, 0.0  ;;  %v254_v36 = vpop.eup %253 }
  0xbc   :  { %v81_v37 = vsel %vm50_vm0, %v254_v36, 0.0  ;;  %v256_v38 = vpop.eup %255  ;;  %v126_v45 = vmul.f32 %v254_v36, %v120_v41  ;;  %v184_v50 = vmul.f32 %v254_v36, %v178_v46 }
  0xbd   :  { %93 = vadd.xlane.f32.xlu0 %v92_v30  ;;  %v116_v39 = vsel %vm50_vm0, %v256_v38, 0.0  ;;  %v258_v40 = vpop.eup %257  ;;  %v121_v43 = vmul.f32 %v256_v38, %v120_v41 }
  0xbe   :  { %v174_v42 = vsel %vm50_vm0, %v258_v40, 0.0  ;;  %v127_v47 = vsel %vm50_vm0, %v126_v45, 0.0  ;;  %v179_v48 = vmul.f32 %v258_v40, %v178_v46  ;;  %v185_v51 = vsel %vm50_vm0, %v184_v50, 0.0 }
  0xbf   :  { %v122_v44 = vsel %vm50_vm0, %v121_v43, 0.0 }
  0xc0   :  { %v180_v49 = vsel %vm50_vm0, %v179_v48, 0.0 }
  0xc1   :  { %64 = vadd.xlane.f32.xlu0 %v63_v33 }
  0xc5   :  { %99 = vadd.xlane.f32.xlu0 %v98_v35 }
  0xc9   :  { %82 = vadd.xlane.f32.xlu0 %v81_v37 }
  0xcd   :  { %117 = vadd.xlane.f32.xlu0 %v116_v39 }
  0xd1   :  { %175 = vadd.xlane.f32.xlu0 %v174_v42 }
  0xd5   :  { %123 = vadd.xlane.f32.xlu0 %v122_v44 }
  0xd9   :  { %128 = vadd.xlane.f32.xlu0 %v127_v47 }
  0xdd   :  { %181 = vadd.xlane.f32.xlu0 %v180_v49 }
  0xe1   :  { %186 = vadd.xlane.f32.xlu0 %v185_v51 }
  0xe5   :  { %157 = vadd.xlane.f32.xlu0 %v156_v53 }
 0x141   :  { %v152_v4 = vpop.xlane.xlu1 %151 }
 0x142   :  { %v59_v54 = vpop.xlane.xlu0 %58 }
 0x143   :  { %259 = vlog2.f32 %v59_v54 }
 0x146   :  { %v94_v55 = vpop.xlane.xlu0 %93 }
 0x147   :  { %261 = vlog2.f32 %v94_v55 }
 0x14a   :  { %v65_v56 = vpop.xlane.xlu0 %64 }
 0x14e   :  { %v100_v57 = vpop.xlane.xlu0 %99 }
 0x150   :  { %v260_v58 = vpop.eup %259 }
 0x151   :  { %v61_v59 = vmul.f32 0.6931472, %v260_v58 }
 0x152   :  { %v83_v60 = vpop.xlane.xlu0 %82 }
 0x153   :  { %v66_v61 = vsub.f32 %v61_v59, %v65_v56  ;;  %263 = vrcp.f32 %v83_v60 }
 0x154   :  { %v262_v62 = vpop.eup %261 }
 0x155   :  { %v96_v63 = vmul.f32 0.6931472, %v262_v62  ;;  %v68_v0 = vsel %vm67_vm2, %v66_v61, 0.0 }
 0x156   :  { %69 = vadd.xlane.f32.xlu0 %v68_v0  ;;  %v118_v1 = vpop.xlane.xlu0 %117 }
 0x157   :  { %v101_v2 = vsub.f32 %v96_v63, %v100_v57  ;;  %265 = vrcp.f32 %v118_v1 }
 0x159   :  { %v102_v3 = vsel %vm67_vm2, %v101_v2, 0.0 }
 0x15a   :  { %103 = vadd.xlane.f32.xlu1 %v102_v3  ;;  %v176_v5 = vpop.xlane.xlu0 %175 }
 0x15b   :  { %267 = vrcp.f32 %v176_v5 }
 0x15c   :  { %269 = vlog2.f32 %v152_v4 }
 0x15e   :  { %v124_v6 = vpop.xlane.xlu0 %123 }
 0x160   :  { %v264_v8 = vpop.eup %263 }
 0x162   :  { %v129_v7 = vpop.xlane.xlu0 %128 }
 0x163   :  { %v130_v11 = vmul.f32 %v264_v8, %v129_v7 }
 0x164   :  { %v266_v9 = vpop.eup %265 }
 0x165   :  { %v125_v10 = vmul.f32 %v266_v9, %v124_v6 }
 0x166   :  { %v182_v12 = vpop.xlane.xlu0 %181 }
 0x167   :  { %v131_v13 = vsub.f32 %v125_v10, %v130_v11 }
 0x168   :  { %v268_v14 = vpop.eup %267 }
 0x169   :  { %v132_v15 = vsel %vm67_vm2, %v131_v13, 0.0  ;;  %v270_v16 = vpop.eup %269  ;;  %v183_v18 = vmul.f32 %v268_v14, %v182_v12 }
 0x16a   :  { %133 = vadd.xlane.f32.xlu0 %v132_v15  ;;  %v187_v17 = vpop.xlane.xlu0 %186  ;;  %v154_v20 = vmul.f32 0.6931472, %v270_v16 }
 0x16b   :  { %v188_v19 = vmul.f32 %v264_v8, %v187_v17 }
 0x16d   :  { %v189_v21 = vsub.f32 %v183_v18, %v188_v19 }
 0x16e   :  { %v158_v22 = vpop.xlane.xlu0 %157 }
 0x16f   :  { %v159_v23 = vsub.f32 %v154_v20, %v158_v22  ;;  %v190_v24 = vsel %vm67_vm2, %v189_v21, 0.0 }
 0x170   :  { %191 = vadd.xlane.f32.xlu0 %v190_v24 }
 0x171   :  { %v160_v25 = vsel %vm67_vm2, %v159_v23, 0.0 }
 0x172   :  { %161 = vadd.xlane.f32.xlu1 %v160_v25 }
 0x1df   :  { %v70_v26 = vpop.xlane.xlu0 %69 }
 0x1e0   :  { %v71_v27 = vrot.slane %v70_v26, 4 }
 0x1e2   :  { %v72_v28 = vadd.f32 %v71_v27, %v70_v26 }
 0x1e3   :  { %v104_v29 = vpop.xlane.xlu1 %103 }
 0x1e4   :  { %v73_v30 = vrot.slane %v72_v28, 2  ;;  %v105_v31 = vrot.slane %v104_v29, 4 }
 0x1e6   :  { %v106_v32 = vadd.f32 %v105_v31, %v104_v29  ;;  %v74_v33 = vadd.f32 %v73_v30, %v72_v28 }
 0x1e8   :  { %v107_v34 = vrot.slane %v106_v32, 2  ;;  %v75_v35 = vrot.slane %v74_v33, 1 }
 0x1ea   :  { %v76_v36 = vadd.f32 %v75_v35, %v74_v33  ;;  %v108_v37 = vadd.f32 %v107_v34, %v106_v32 }
 0x1ec   :  { %231 = vpush %v76_v36  ;;  %v109_v38 = vrot.slane %v108_v37, 1 }
 0x1ee   :  { %v110_v39 = vadd.f32 %v109_v38, %v108_v37 }
 0x1f0   :  { %233 = vpush %v110_v39 }
 0x1f3   :  { %v134_v40 = vpop.xlane.xlu0 %133 }
 0x1f4   :  { %v135_v41 = vrot.slane %v134_v40, 4 }
 0x1f6   :  { %v136_v42 = vadd.f32 %v135_v41, %v134_v40 }
 0x1f8   :  { %v137_v43 = vrot.slane %v136_v42, 2 }
 0x1f9   :  { %v192_v44 = vpop.xlane.xlu0 %191 }
 0x1fa   :  { %v193_v45 = vrot.slane %v192_v44, 4  ;;  %v138_v46 = vadd.f32 %v137_v43, %v136_v42 }
 0x1fb   :  { %v162_v47 = vpop.xlane.xlu1 %161 }
 0x1fc   :  { %v194_v48 = vadd.f32 %v193_v45, %v192_v44  ;;  %v163_v49 = vrot.slane %v162_v47, 4  ;;  %v139_v50 = vrot.slane %v138_v46, 1 }
 0x1fe   :  { %v195_v51 = vrot.slane %v194_v48, 2  ;;  %v164_v52 = vadd.f32 %v163_v49, %v162_v47  ;;  %v140_v53 = vadd.f32 %v139_v50, %v138_v46 }
 0x200   :  { %v196_v54 = vadd.f32 %v195_v51, %v194_v48  ;;  %v165_v55 = vrot.slane %v164_v52, 2  ;;  %235 = vpush %v140_v53 }
 0x202   :  { %v166_v56 = vadd.f32 %v165_v55, %v164_v52  ;;  %v197_v57 = vrot.slane %v196_v54, 1 }
 0x204   :  { %v167_v58 = vrot.slane %v166_v56, 1  ;;  %v198_v60 = vadd.f32 %v197_v57, %v196_v54 }
 0x206   :  { %v168_v59 = vadd.f32 %v167_v58, %v166_v56 }
 0x208   :  { %237 = vpush %v168_v59 }
 0x209   :  { %239 = vpush %v198_v60 }
 0x21d   :  { %s232_s0 = spop %231 }
 0x221   :  { %s234_s1 = spop %233 }
 0x222   :  { %s112_s27 = sadd.f32 %s234_s1, %s232_s0 }
 0x231   :  { %s236_s28 = spop %235 }
 0x239   :  { %s238_s29 = spop %237 }
 0x23a   :  { %s170_s30 = sadd.f32 %s238_s29, %s112_s27  ;;  %s240_s5 = spop %239 }
 0x23b   :  { %s200_s6 = sadd.f32 %s240_s5, %s236_s28 }
 0x23c   :  { %s201_s7 = smul.f32 0.125, %s170_s30 }
 0x23d   :  { %s206_s8 = smul.f32 0.33333334, %s200_s6 }
 0x23e   :  { %s204_s9 = smul.f32 0.33333334, %s201_s7 }
 0x23f   :  { %s207_s10 = smul.f32 0.125, %s206_s8 }
 0x240   :  { %s205_s12 = smul.f32 0.667, %s204_s9 }
 0x241   :  { %s210_s11 = smul.f32 0.25, %s207_s10 }
 0x243   :  { %s211_s13 = smul.f32 0.333, %s210_s11 }
 0x245   :  { %s212_s16 = sadd.f32 %s211_s13, %s205_s12 }
 0x247   :  { %v213_v61 = vstv %s212_s16 }
 0x248   :  { %214 = vst [vmem:[#allocation7] sm:$0xff] %v213_v61 }
 0x249   :  { %322 = shalt.err (!%p319_p0)
}
 0x24a   :  { %224 = dma.vmem_to_hbm [thread:$0]  %s222_s15, 128, %s420_s4, [#allocation4]  }
 0x24b   :  { %335 = dma.done.wait [#allocation4], 128  }
 0x24c   :  { %336 = vsyncadd [#allocation4], 4294967168 }
 0x24d   :  { %228 = vsyncpa [#allocation3], 1 }
 0x24e   :  { %229 = vsyncpa [#allocation6], 1 }
 0x24f   :  { %230 = vsyncpa [#allocation4], 1 }

</bundles_post_ra>
